<compile_context>
chip_gen: v5e
topology: v5e:2x2
jax: 0.10.0
libtpu: 0.0.40
codegen_flags: <defaults>
</compile_context>

<pallas_src>
import jax
import jax.numpy as jnp
import numpy as np
from jax.experimental import pallas as pl
from jax.experimental.pallas import tpu as pltpu

_LANE = 128
_SUBLANE = 8  # f32 sublane granule; would be 16 if operands were flipped to bf16.


def _round_up(v, m):
    return (v + m - 1) // m * m


def _full_block(shape):
    """Whole-array block for a single-program (grid=(1,)) pallas_call."""
    nd = len(shape)
    return pl.BlockSpec(shape, lambda i, _nd=nd: (0,) * _nd)


# ----------------------------------------------------------------------------
# Fused kernel:  Linear(3,3)  ->  grouped / strided / dilated Conv2d or
# ConvTranspose2d  ->  bias  ->  lane-dense output grid.  One program, all VMEM.
# ----------------------------------------------------------------------------
def _fused_forward_kernel(x_ref, lcol_ref, lb_ref, a_ref, g_ref, s_ref, b_ref,
                          o_ref):
    # x_ref    (CP, MP)     input channels on sublanes, flattened (n, h, w) on lanes
    # lcol_ref (MP, MP)     I_{N*H} (x) lin_w^T : applies Linear(3,3) along the w axis
    # lb_ref   (1,  MP)     lin_b tiled over the valid (n, h, w') columns
    # a_ref    (T, OCP, CP) per-tap grouped channel mix (conv weights; 0 across groups)
    # g_ref    (T, MP, MQ)  per-tap 0/1 gather: (n, h, w') source cols -> (n, j, i) data cols
    #                       (encodes stride / dilation / zero padding / ConvT phases)
    # s_ref    (MQ, MO)     0/1 scatter: data cols -> full lane-dense output grid cols
    # b_ref    (OCP, 1)     conv / conv_transpose bias
    # o_ref    (OCP, MO)    output: channels on sublanes, flattened (n, oh, ow) on lanes
    y = jnp.dot(x_ref[...], lcol_ref[...], preferred_element_type=jnp.float32)
    y = y + lb_ref[...]      # junk in padding rows / cols is filtered by A / G below

    ntaps = a_ref.shape[0]
    acc = jnp.zeros((a_ref.shape[1], g_ref.shape[2]), jnp.float32)
    for t in range(ntaps):   # static unroll: 3 taps (conv) or 9 taps (conv_transpose)
        p_t = jnp.dot(y, g_ref[t], preferred_element_type=jnp.float32)
        acc = acc + jnp.dot(a_ref[t], p_t, preferred_element_type=jnp.float32)

    out = jnp.dot(acc, s_ref[...], preferred_element_type=jnp.float32) + b_ref[...]
    o_ref[...] = out.astype(o_ref.dtype)


def _fused_call(x2, lcol, lb, a, g, scat, b):
    ocp, mo = a.shape[1], scat.shape[1]
    operands = (x2, lcol, lb, a, g, scat, b)
    # VMEM budget derived from the actual (double-buffered) blocks, clamped under
    # the ~32 MiB scoped budget that is safe on v7x (64 MiB physical VMEM).
    block_bytes = sum(int(np.prod(o.shape)) * 4 for o in operands) + ocp * mo * 4
    vmem_limit = int(min(32 << 20, max(8 << 20, 2 * block_bytes + (2 << 20))))
    return pl.pallas_call(
        _fused_forward_kernel,
        out_shape=jax.ShapeDtypeStruct((ocp, mo), jnp.float32),
        grid_spec=pltpu.PrefetchScalarGridSpec(
            num_scalar_prefetch=0,
            grid=(1,),  # single program: total live data is well under 1 MiB
            in_specs=[_full_block(o.shape) for o in operands],
            out_specs=_full_block((ocp, mo)),
        ),
        compiler_params=pltpu.CompilerParams(
            dimension_semantics=("arbitrary",),
            vmem_limit_bytes=vmem_limit,
        ),
    )(*operands)


# ----------------------------------------------------------------------------
# SiuModel equivalent (forward semantics only)
# ----------------------------------------------------------------------------
class SiuModelPallas:
    """Linear(3,3) -> checkpoint(ConvModel(3,6,3)); forward pass only."""

    GROUPS, STRIDE, PADDING, DILATION, K = 3, 2, 1, 2, 3
    IN_CH, OUT_CH, WIDTH = 3, 6, 3

    def __init__(self, bias, key):
        in_ch, out_ch, K = self.IN_CH, self.OUT_CH, self.K
        icpg = in_ch // self.GROUPS
        ocpg = out_ch // self.GROUPS
        k1, k2, k3, k4, k5, k6 = jax.random.split(key, 6)
        lin_scale = 1.0 / jnp.sqrt(3.0)
        conv_scale = 1.0 / jnp.sqrt(icpg * K * K)
        self.lin_w = lin_scale * jax.random.normal(k1, (3, 3), jnp.float32)
        self.conv_w = conv_scale * jax.random.normal(
            k2, (out_ch, icpg, K, K), jnp.float32)       # Conv2d: (OC, IC/g, K, K)
        self.convT_w = conv_scale * jax.random.normal(
            k3, (in_ch, ocpg, K, K), jnp.float32)        # ConvT:  (IC, OC/g, K, K)
        if bias:
            self.lin_b = lin_scale * jax.random.normal(k4, (3,), jnp.float32)
            self.conv_b = conv_scale * jax.random.normal(k5, (out_ch,), jnp.float32)
            self.convT_b = conv_scale * jax.random.normal(k6, (out_ch,), jnp.float32)
        else:
            self.lin_b = jnp.zeros((3,), jnp.float32)
            self.conv_b = jnp.zeros((out_ch,), jnp.float32)
            self.convT_b = jnp.zeros((out_ch,), jnp.float32)
        self._plans = {}  # (N, H, select) -> precomputed kernel constants

    # -- per-shape constant plan (built once with numpy, cached) --------------
    def _plan(self, N, H, select):
        key = (int(N), int(H), int(select))
        if key not in self._plans:
            self._plans[key] = self._build_plan(*key)
        return self._plans[key]

    def _build_plan(self, N, H, select):
        C, W, OC = self.IN_CH, self.WIDTH, self.OUT_CH
        K, st, p, d = self.K, self.STRIDE, self.PADDING, self.DILATION
        ocpg = OC // self.GROUPS

        lin_w = np.asarray(self.lin_w, np.float32)
        lin_b = np.asarray(self.lin_b, np.float32)

        M = N * H * W
        MP = _round_up(M, _LANE)
        CP = _round_up(C, _SUBLANE)
        OCP = _round_up(OC, _SUBLANE)

        # Linear(3,3) along the fastest (w) column index, as a right-multiplication.
        lcol = np.zeros((MP, MP), np.float32)
        lcol[:M, :M] = np.kron(np.eye(N * H, dtype=np.float32), lin_w.T)
        lb = np.zeros((1, MP), np.float32)
        lb[0, :M] = np.tile(lin_b, N * H)

        if select == 0:   # Conv2d(3, 6, 3, pad=1, stride=2, dil=2, groups=3)
            w = np.asarray(self.conv_w, np.float32)      # (OC, IC/g, K, K)
            bias = np.asarray(self.conv_b, np.float32)
            OH = (H + 2 * p - d * (K - 1) - 1) // st + 1
            OW = (W + 2 * p - d * (K - 1) - 1) // st + 1

            def src(o, k):                   # output position -> source position
                return o * st - p + d * k

            def a_entry(oc, c, kh, kw):
                return w[oc, 0, kh, kw] if c == oc // ocpg else 0.0
        else:             # ConvTranspose2d(3, 6, 3, pad=1, stride=2, dil=2, groups=3)
            w = np.asarray(self.convT_w, np.float32)     # (IC, OC/g, K, K)
            bias = np.asarray(self.convT_b, np.float32)
            OH = (H - 1) * st - 2 * p + d * (K - 1) + 1
            OW = (W - 1) * st - 2 * p + d * (K - 1) + 1

            def src(o, k):                   # -1 => no source (wrong sub-pixel phase)
                num = o + p - d * k
                return num // st if num % st == 0 else -1

            def a_entry(oc, c, kh, kw):
                return w[c, oc % ocpg, kh, kw] if c == oc // ocpg else 0.0

        # Output positions that receive at least one real tap ("data grid"); the
        # remaining ConvTranspose positions are bias-only (sub-pixel phase holes).
        data_oh = [o for o in range(OH) if any(0 <= src(o, k) < H for k in range(K))]
        data_ow = [o for o in range(OW) if any(0 <= src(o, k) < W for k in range(K))]
        Jh, Jw = len(data_oh), len(data_ow)
        MQ = _round_up(max(N * Jh * Jw, 1), _LANE)
        MO = _round_up(N * OH * OW, _LANE)

        a_list, g_list = [], []
        for kh in range(K):
            for kw in range(K):
                gt = np.zeros((MP, MQ), np.float32)
                for jj, oh in enumerate(data_oh):
                    ih = src(oh, kh)
                    if not 0 <= ih < H:
                        continue
                    for ii, ow in enumerate(data_ow):
                        iw = src(ow, kw)
                        if not 0 <= iw < W:
                            continue
                        for n in range(N):
                            gt[n * H * W + ih * W + iw,
                               n * Jh * Jw + jj * Jw + ii] = 1.0
                if not gt.any():
                    continue                 # tap only ever reads zero padding -> drop
                at = np.zeros((OCP, CP), np.float32)
                for oc in range(OC):
                    for c in range(C):
                        at[oc, c] = a_entry(oc, c, kh, kw)
                a_list.append(at)
                g_list.append(gt)
        if not a_list:                       # degenerate safety net: bias-only output
            a_list = [np.zeros((OCP, CP), np.float32)]
            g_list = [np.zeros((MP, MQ), np.float32)]

        scat = np.zeros((MQ, MO), np.float32)
        for n in range(N):
            for jj, oh in enumerate(data_oh):
                for ii, ow in enumerate(data_ow):
                    scat[n * Jh * Jw + jj * Jw + ii,
                         n * OH * OW + oh * OW + ow] = 1.0

        bcol = np.zeros((OCP, 1), np.float32)
        bcol[:OC, 0] = bias

        return dict(
            CP=CP, MP=MP, OC=OC, OH=OH, OW=OW,
            lcol=jnp.asarray(lcol), lb=jnp.asarray(lb),
            a=jnp.asarray(np.stack(a_list)), g=jnp.asarray(np.stack(g_list)),
            s=jnp.asarray(scat), b=jnp.asarray(bcol),
        )

    # -- forward ---------------------------------------------------------------
    def __call__(self, x, select=0):
        N, C, H, W = x.shape
        assert C == self.IN_CH and W == self.WIDTH, x.shape
        plan = self._plan(N, H, select)
        # Single layout prep: channels -> sublanes, flattened (n, h, w) -> lanes.
        xt = x.astype(jnp.float32).transpose(1, 0, 2, 3).reshape(C, N * H * W)
        xt = jnp.pad(xt, ((0, plan["CP"] - C), (0, plan["MP"] - N * H * W)))
        raw = _fused_call(xt, plan["lcol"], plan["lb"], plan["a"], plan["g"],
                          plan["s"], plan["b"])
        OC, OH, OW = plan["OC"], plan["OH"], plan["OW"]
        out = raw[:OC, :N * OH * OW].reshape(OC, N, OH, OW).transpose(1, 0, 2, 3)
        return out


# ----------------------------------------------------------------------------
# Pure-lax reference (numerical ground truth)
# ----------------------------------------------------------------------------
def _ref_forward(model, x, select):
    hp = jax.lax.Precision.HIGHEST
    y = jnp.matmul(x, model.lin_w.T, precision=hp) + model.lin_b
    g = model.GROUPS
    s, p, d, K = model.STRIDE, model.PADDING, model.DILATION, model.K
    if select == 0:
        out = jax.lax.conv_general_dilated(
            y, model.conv_w, window_strides=(s, s), padding=[(p, p), (p, p)],
            rhs_dilation=(d, d), feature_group_count=g,
            dimension_numbers=("NCHW", "OIHW", "NCHW"), precision=hp)
        return out + model.conv_b.reshape(1, -1, 1, 1)
    IC, ocpg, _, _ = model.convT_w.shape
    icpg = IC // g
    w = model.convT_w.reshape(g, icpg, ocpg, K, K)[..., ::-1, ::-1]
    w = w.transpose(0, 2, 1, 3, 4).reshape(g * ocpg, icpg, K, K)
    eff = d * (K - 1) - p
    out = jax.lax.conv_general_dilated(
        y, w, window_strides=(1, 1), padding=[(eff, eff), (eff, eff)],
        lhs_dilation=(s, s), rhs_dilation=(d, d), feature_group_count=g,
        dimension_numbers=("NCHW", "OIHW", "NCHW"), precision=hp)
    return out + model.convT_b.reshape(1, -1, 1, 1)


if __name__ == "__main__":
    key = jax.random.PRNGKey(0)
    kx, kp = jax.random.split(key)
    model = SiuModelPallas(bias=True, key=kp)

    # Forward implies: last dim = 3 (Linear(3,3)) and channels = 3 (Conv in_channels).
    x = jax.random.normal(kx, (2, 3, 16, 3), jnp.float32)

    conv_fwd = jax.jit(lambda v: model(v, select=0))
    convT_fwd = jax.jit(lambda v: model(v, select=1))

    y_conv = conv_fwd(x)      # -> (2, 6, 7, 1)
    y_convT = convT_fwd(x)    # -> (2, 6, 33, 7)
    jax.block_until_ready((y_conv, y_convT))

    assert y_conv.shape == (2, 6, 7, 1), y_conv.shape
    assert y_convT.shape == (2, 6, 33, 7), y_convT.shape

    r_conv = _ref_forward(model, x, 0)
    r_convT = _ref_forward(model, x, 1)

    # Structural check (exact regardless of MXU matmul precision): ConvTranspose
    # sub-pixel phase holes (even output rows) must equal the bias exactly --
    # any tap / phase indexing bug would show up here as an O(1) error.
    hole_err = float(jnp.max(jnp.abs(
        y_convT[:, :, 0::2, :] - model.convT_b.reshape(1, -1, 1, 1))))
    assert hole_err < 1e-5, ("conv_transpose phase/bias placement wrong", hole_err)

    # Value check vs. HIGHEST-precision lax reference.  5e-2 covers worst-case
    # MXU default-precision rounding of the f32 operand chain (indexing bugs
    # would be O(1), ~30x larger); with exact f32 MXU passes the error is ~1e-6.
    err0 = float(jnp.max(jnp.abs(y_conv - r_conv)))
    err1 = float(jnp.max(jnp.abs(y_convT - r_convT)))
    assert err0 < 5e-2, ("conv path mismatch", err0)
    assert err1 < 5e-2, ("conv_transpose path mismatch", err1)

    print("KERNEL_OK")
</pallas_src>

<mosaic_0001>
module attributes {stable_mosaic.version = 11 : i64} {
  func.func @_fused_forward_kernel(%arg0: i32, %arg1: memref<8x128xf32, #tpu.memory_space<vmem>>, %arg2: memref<128x128xf32, #tpu.memory_space<vmem>>, %arg3: memref<1x128xf32, #tpu.memory_space<vmem>>, %arg4: memref<3x8x8xf32, #tpu.memory_space<vmem>>, %arg5: memref<3x128x128xf32, #tpu.memory_space<vmem>>, %arg6: memref<128x128xf32, #tpu.memory_space<vmem>>, %arg7: memref<8x1xf32, #tpu.memory_space<vmem>>, %arg8: memref<8x128xf32, #tpu.memory_space<vmem>>) attributes {dimension_semantics = [#tpu.dimension_semantics<arbitrary>], iteration_bounds = array<i64: 1>, scalar_prefetch = 0 : i64, scratch_operands = 0 : i64, tpu.core_type = #tpu.core_type<tc>, window_params = [{pipeline_mode = #tpu.pipeline_mode<synchronous>, transform_indices = @transform_0, window_bounds = array<i64: 8, 128>}, {pipeline_mode = #tpu.pipeline_mode<synchronous>, transform_indices = @transform_1, window_bounds = array<i64: 128, 128>}, {pipeline_mode = #tpu.pipeline_mode<synchronous>, transform_indices = @transform_2, window_bounds = array<i64: 1, 128>}, {pipeline_mode = #tpu.pipeline_mode<synchronous>, transform_indices = @transform_3, window_bounds = array<i64: 3, 8, 8>}, {pipeline_mode = #tpu.pipeline_mode<synchronous>, transform_indices = @transform_4, window_bounds = array<i64: 3, 128, 128>}, {pipeline_mode = #tpu.pipeline_mode<synchronous>, transform_indices = @transform_5, window_bounds = array<i64: 128, 128>}, {pipeline_mode = #tpu.pipeline_mode<synchronous>, transform_indices = @transform_6, window_bounds = array<i64: 8, 1>}, {pipeline_mode = #tpu.pipeline_mode<synchronous>, transform_indices = @transform_7, window_bounds = array<i64: 8, 128>}]} {
    %c0 = arith.constant 0 : index
    %c0_0 = arith.constant 0 : index
    %0 = vector.load %arg1[%c0, %c0_0] : memref<8x128xf32, #tpu.memory_space<vmem>>, vector<8x128xf32>
    %c0_1 = arith.constant 0 : index
    %c0_2 = arith.constant 0 : index
    %1 = vector.load %arg2[%c0_1, %c0_2] : memref<128x128xf32, #tpu.memory_space<vmem>>, vector<128x128xf32>
    %cst = arith.constant dense<0.000000e+00> : vector<8x128xf32>
    %2 = tpu.matmul %0, %1, %cst {dimension_numbers = #tpu.dot_dimension_numbers<[1], [0], [0], [1], [0, 0, 1, 1], [], []>} : vector<8x128xf32>, vector<128x128xf32>, vector<8x128xf32> -> vector<8x128xf32>
    %c0_3 = arith.constant 0 : index
    %c0_4 = arith.constant 0 : index
    %3 = vector.load %arg3[%c0_3, %c0_4] : memref<1x128xf32, #tpu.memory_space<vmem>>, vector<1x128xf32>
    %4 = vector.broadcast %3 : vector<1x128xf32> to vector<8x128xf32>
    %5 = arith.addf %2, %4 : vector<8x128xf32>
    %cst_5 = arith.constant 0.000000e+00 : f32
    %6 = vector.broadcast %cst_5 : f32 to vector<8x128xf32>
    %c0_6 = arith.constant 0 : index
    %c0_7 = arith.constant 0 : index
    %c0_8 = arith.constant 0 : index
    %7 = vector.load %arg5[%c0_6, %c0_7, %c0_8] : memref<3x128x128xf32, #tpu.memory_space<vmem>>, vector<1x128x128xf32>
    %8 = vector.shape_cast %7 : vector<1x128x128xf32> to vector<128x128xf32>
    %cst_9 = arith.constant dense<0.000000e+00> : vector<8x128xf32>
    %9 = tpu.matmul %5, %8, %cst_9 {dimension_numbers = #tpu.dot_dimension_numbers<[1], [0], [0], [1], [0, 0, 1, 1], [], []>} : vector<8x128xf32>, vector<128x128xf32>, vector<8x128xf32> -> vector<8x128xf32>
    %c0_10 = arith.constant 0 : index
    %c0_11 = arith.constant 0 : index
    %c0_12 = arith.constant 0 : index
    %10 = vector.load %arg4[%c0_10, %c0_11, %c0_12] : memref<3x8x8xf32, #tpu.memory_space<vmem>>, vector<1x8x8xf32>
    %11 = vector.shape_cast %10 : vector<1x8x8xf32> to vector<8x8xf32>
    %cst_13 = arith.constant dense<0.000000e+00> : vector<8x128xf32>
    %12 = tpu.matmul %11, %9, %cst_13 {dimension_numbers = #tpu.dot_dimension_numbers<[1], [0], [0], [1], [0, 0, 1, 1], [], []>} : vector<8x8xf32>, vector<8x128xf32>, vector<8x128xf32> -> vector<8x128xf32>
    %13 = arith.addf %6, %12 : vector<8x128xf32>
    %c1 = arith.constant 1 : index
    %c0_14 = arith.constant 0 : index
    %c0_15 = arith.constant 0 : index
    %14 = vector.load %arg5[%c1, %c0_14, %c0_15] : memref<3x128x128xf32, #tpu.memory_space<vmem>>, vector<1x128x128xf32>
    %15 = vector.shape_cast %14 : vector<1x128x128xf32> to vector<128x128xf32>
    %cst_16 = arith.constant dense<0.000000e+00> : vector<8x128xf32>
    %16 = tpu.matmul %5, %15, %cst_16 {dimension_numbers = #tpu.dot_dimension_numbers<[1], [0], [0], [1], [0, 0, 1, 1], [], []>} : vector<8x128xf32>, vector<128x128xf32>, vector<8x128xf32> -> vector<8x128xf32>
    %c1_17 = arith.constant 1 : index
    %c0_18 = arith.constant 0 : index
    %c0_19 = arith.constant 0 : index
    %17 = vector.load %arg4[%c1_17, %c0_18, %c0_19] : memref<3x8x8xf32, #tpu.memory_space<vmem>>, vector<1x8x8xf32>
    %18 = vector.shape_cast %17 : vector<1x8x8xf32> to vector<8x8xf32>
    %cst_20 = arith.constant dense<0.000000e+00> : vector<8x128xf32>
    %19 = tpu.matmul %18, %16, %cst_20 {dimension_numbers = #tpu.dot_dimension_numbers<[1], [0], [0], [1], [0, 0, 1, 1], [], []>} : vector<8x8xf32>, vector<8x128xf32>, vector<8x128xf32> -> vector<8x128xf32>
    %20 = arith.addf %13, %19 : vector<8x128xf32>
    %c2 = arith.constant 2 : index
    %c0_21 = arith.constant 0 : index
    %c0_22 = arith.constant 0 : index
    %21 = vector.load %arg5[%c2, %c0_21, %c0_22] : memref<3x128x128xf32, #tpu.memory_space<vmem>>, vector<1x128x128xf32>
    %22 = vector.shape_cast %21 : vector<1x128x128xf32> to vector<128x128xf32>
    %cst_23 = arith.constant dense<0.000000e+00> : vector<8x128xf32>
    %23 = tpu.matmul %5, %22, %cst_23 {dimension_numbers = #tpu.dot_dimension_numbers<[1], [0], [0], [1], [0, 0, 1, 1], [], []>} : vector<8x128xf32>, vector<128x128xf32>, vector<8x128xf32> -> vector<8x128xf32>
    %c2_24 = arith.constant 2 : index
    %c0_25 = arith.constant 0 : index
    %c0_26 = arith.constant 0 : index
    %24 = vector.load %arg4[%c2_24, %c0_25, %c0_26] : memref<3x8x8xf32, #tpu.memory_space<vmem>>, vector<1x8x8xf32>
    %25 = vector.shape_cast %24 : vector<1x8x8xf32> to vector<8x8xf32>
    %cst_27 = arith.constant dense<0.000000e+00> : vector<8x128xf32>
    %26 = tpu.matmul %25, %23, %cst_27 {dimension_numbers = #tpu.dot_dimension_numbers<[1], [0], [0], [1], [0, 0, 1, 1], [], []>} : vector<8x8xf32>, vector<8x128xf32>, vector<8x128xf32> -> vector<8x128xf32>
    %27 = arith.addf %20, %26 : vector<8x128xf32>
    %c0_28 = arith.constant 0 : index
    %c0_29 = arith.constant 0 : index
    %28 = vector.load %arg6[%c0_28, %c0_29] : memref<128x128xf32, #tpu.memory_space<vmem>>, vector<128x128xf32>
    %cst_30 = arith.constant dense<0.000000e+00> : vector<8x128xf32>
    %29 = tpu.matmul %27, %28, %cst_30 {dimension_numbers = #tpu.dot_dimension_numbers<[1], [0], [0], [1], [0, 0, 1, 1], [], []>} : vector<8x128xf32>, vector<128x128xf32>, vector<8x128xf32> -> vector<8x128xf32>
    %c0_31 = arith.constant 0 : index
    %c0_32 = arith.constant 0 : index
    %30 = vector.load %arg7[%c0_31, %c0_32] : memref<8x1xf32, #tpu.memory_space<vmem>>, vector<8x1xf32>
    %31 = vector.broadcast %30 : vector<8x1xf32> to vector<8x128xf32>
    %32 = arith.addf %29, %31 : vector<8x128xf32>
    %c0_33 = arith.constant 0 : index
    %c0_34 = arith.constant 0 : index
    %33 = vector.load %arg8[%c0_33, %c0_34] : memref<8x128xf32, #tpu.memory_space<vmem>>, vector<8x128xf32>
    tpu.vector_store %arg8[%c0_33, %c0_34], %32 {strides = array<i32>} : memref<8x128xf32, #tpu.memory_space<vmem>>, vector<8x128xf32>,
    return
  }
  func.func @transform_0(%arg0: i32) -> (i32, i32) {
    %c0_i32 = arith.constant 0 : i32
    %c0_i32_0 = arith.constant 0 : i32
    %c0_i32_1 = arith.constant 0 : i32
    return %c0_i32, %c0_i32_0 : i32, i32
  }
  func.func @transform_1(%arg0: i32) -> (i32, i32) {
    %c0_i32 = arith.constant 0 : i32
    %c0_i32_0 = arith.constant 0 : i32
    %c0_i32_1 = arith.constant 0 : i32
    return %c0_i32, %c0_i32_0 : i32, i32
  }
  func.func @transform_2(%arg0: i32) -> (i32, i32) {
    %c0_i32 = arith.constant 0 : i32
    %c0_i32_0 = arith.constant 0 : i32
    %c0_i32_1 = arith.constant 0 : i32
    return %c0_i32, %c0_i32_0 : i32, i32
  }
  func.func @transform_3(%arg0: i32) -> (i32, i32, i32) {
    %c0_i32 = arith.constant 0 : i32
    %c0_i32_0 = arith.constant 0 : i32
    %c0_i32_1 = arith.constant 0 : i32
    %c0_i32_2 = arith.constant 0 : i32
    return %c0_i32, %c0_i32_0, %c0_i32_1 : i32, i32, i32
  }
  func.func @transform_4(%arg0: i32) -> (i32, i32, i32) {
    %c0_i32 = arith.constant 0 : i32
    %c0_i32_0 = arith.constant 0 : i32
    %c0_i32_1 = arith.constant 0 : i32
    %c0_i32_2 = arith.constant 0 : i32
    return %c0_i32, %c0_i32_0, %c0_i32_1 : i32, i32, i32
  }
  func.func @transform_5(%arg0: i32) -> (i32, i32) {
    %c0_i32 = arith.constant 0 : i32
    %c0_i32_0 = arith.constant 0 : i32
    %c0_i32_1 = arith.constant 0 : i32
    return %c0_i32, %c0_i32_0 : i32, i32
  }
  func.func @transform_6(%arg0: i32) -> (i32, i32) {
    %c0_i32 = arith.constant 0 : i32
    %c0_i32_0 = arith.constant 0 : i32
    %c0_i32_1 = arith.constant 0 : i32
    return %c0_i32, %c0_i32_0 : i32, i32
  }
  func.func @transform_7(%arg0: i32) -> (i32, i32) {
    %c0_i32 = arith.constant 0 : i32
    %c0_i32_0 = arith.constant 0 : i32
    %c0_i32_1 = arith.constant 0 : i32
    return %c0_i32, %c0_i32_0 : i32, i32
  }
}

</mosaic_0001>

<bundles_post_ra>
// kernel: _lambda_.1
= control target key start
LH: loop header
LB: loop body
LE: loop exit
PB: predicated region body
PF: predicated region fallthrough
CT: control target
= control target key end

     0   :  { %12 = vsyncpa [#allocation3], 0  ;;  %s521_s0 = inlined_call_operand.vmem [shape: f32[8,128], index: 0, kind: input, shape index: {}]   ;;  %s522_s1 = inlined_call_operand.hbm [shape: f32[128,128], index: 1, kind: input, shape index: {}]   ;;  %s523_s2 = inlined_call_operand.vmem [shape: f32[1,128], index: 2, kind: input, shape index: {}]   ;;  %s524_s3 = inlined_call_operand.vmem [shape: f32[3,8,8], index: 3, kind: input, shape index: {}]   ;;  %s525_s4 = inlined_call_operand.hbm [shape: f32[3,128,128], index: 4, kind: input, shape index: {}]   ;;  %s526_s5 = inlined_call_operand.vmem [shape: f32[128,128], index: 5, kind: input, shape index: {}]   ;;  %s527_s6 = inlined_call_operand.vmem [shape: f32[8,1], index: 6, kind: input, shape index: {}]   ;;  %s528_s7 = inlined_call_operand.vmem [shape: f32[8,128], index: 7, kind: output, shape index: {}]  }
   0x1   :  { %s20_s26 = sshll.u32 %s522_s1, 4  ;;  %s21_s26 = int_to_ptr.hbm [resolvable:$true] %s20_s26 }
   0x2   :  { %13 = vsyncpa [#allocation5], 0  ;;  %s398_s27 = smov [#allocation2]   ;;  %s37_s8 = sshll.u32 %s525_s4, 4  ;;  %s38_s8 = int_to_ptr.hbm [resolvable:$true] %s37_s8 }
   0x3   :  { %s22_s28 = sshll.u32 %s398_s27, 4  ;;  %s399_s9 = smov 128   ;;  %s23_s28 = int_to_ptr.vmem [resolvable:$true] %s22_s28 }
   0x4   :  { %s400_s10 = smov 8   ;;  %s401_s11 = smov [#allocation4]  }
   0x5   :  { %28 = dma.hbm_to_vmem [thread:$0]  %s21_s26, 2048, %s23_s28, [#allocation3], %s399_s9, %s399_s9, %s400_s10  }
   0x6   :  { %s39_s12 = sshll.u32 %s401_s11, 4  ;;  %s40_s12 = int_to_ptr.vmem [resolvable:$true] %s39_s12 }
   0x7   :  { %45 = dma.hbm_to_vmem [thread:$0]  %s38_s8, 6144, %s40_s12, [#allocation5], %s399_s9, %s399_s9, %s400_s10  }
   0x8   :  { %394 = dma.done.wait [#allocation3], 2048  }
   0x9   :  { %395 = vsyncadd [#allocation3], 4294965248 }
   0xa   :  { %396 = dma.done.wait [#allocation5], 6144  }
   0xb   :  { %397 = vsyncadd [#allocation5], 4294961152  ;;  %v74_v0 = vld [vmem:[#allocation2 + $0x78] sm:$0xff]  ;;  %v73_v1 = vld [vmem:[#allocation2 + $0x70] sm:$0xff]  ;;  %vm175_vm0 = vcmask 64512  }
   0xc   :  { %79 = vmatpush.msra.mxu0 %v74_v0  ;;  %v72_v2 = vld [vmem:[#allocation2 + $0x68] sm:$0xff]  ;;  %v71_v3 = vld [vmem:[#allocation2 + $0x60] sm:$0xff]  ;;  %v70_v4 = vld [vmem:[#allocation2 + $0x58] sm:$0xff] }
   0xd   :  { %v114_v5 = vld [vmem:[#allocation4 + $0x78] sm:$0xff]  ;;  %v113_v7 = vld [vmem:[#allocation4 + $0x70] sm:$0xff]  ;;  %v112_v9 = vld [vmem:[#allocation4 + $0x68] sm:$0xff] }
   0xe   :  { %80 = vmatpush.msra.mxu0 %v73_v1  ;;  %115 = vmatpush.msra.mxu1 %v114_v5  ;;  %v152_v6 = vld [vmem:[#allocation4 + $0xf8] sm:$0xff]  ;;  %v151_v8 = vld [vmem:[#allocation4 + $0xf0] sm:$0xff]  ;;  %v150_v11 = vld [vmem:[#allocation4 + $0xe8] sm:$0xff] }
   0xf   :  { %153 = vmatpush.msra.mxu2 %v152_v6  ;;  %v69_v10 = vld [vmem:[#allocation2 + $0x50] sm:$0xff]  ;;  %v111_v12 = vld [vmem:[#allocation4 + $0x60] sm:$0xff]  ;;  %v68_v13 = vld [vmem:[#allocation2 + $0x48] sm:$0xff] }
  0x10   :  { %81 = vmatpush.msra.mxu0 %v72_v2  ;;  %116 = vmatpush.msra.mxu1 %v113_v7  ;;  %v149_v14 = vld [vmem:[#allocation4 + $0xe0] sm:$0xff]  ;;  %v110_v15 = vld [vmem:[#allocation4 + $0x58] sm:$0xff]  ;;  %v109_v18 = vld [vmem:[#allocation4 + $0x50] sm:$0xff] }
  0x11   :  { %154 = vmatpush.msra.mxu2 %v151_v8  ;;  %v67_v16 = vld [vmem:[#allocation2 + $0x40] sm:$0xff]  ;;  %v148_v17 = vld [vmem:[#allocation4 + $0xd8] sm:$0xff]  ;;  %v147_v20 = vld [vmem:[#allocation4 + $0xd0] sm:$0xff] }
  0x12   :  { %82 = vmatpush.msra.mxu0 %v71_v3  ;;  %117 = vmatpush.msra.mxu1 %v112_v9  ;;  %v66_v19 = vld [vmem:[#allocation2 + $0x38] sm:$0xff]  ;;  %v108_v21 = vld [vmem:[#allocation4 + $0x48] sm:$0xff]  ;;  %v65_v22 = vld [vmem:[#allocation2 + $0x30] sm:$0xff] }
  0x13   :  { %155 = vmatpush.msra.mxu2 %v150_v11  ;;  %v146_v23 = vld [vmem:[#allocation4 + $0xc8] sm:$0xff]  ;;  %v107_v24 = vld [vmem:[#allocation4 + $0x40] sm:$0xff]  ;;  %v106_v27 = vld [vmem:[#allocation4 + $0x38] sm:$0xff] }
  0x14   :  { %83 = vmatpush.msra.mxu0 %v70_v4  ;;  %118 = vmatpush.msra.mxu1 %v111_v12  ;;  %v64_v25 = vld [vmem:[#allocation2 + $0x28] sm:$0xff]  ;;  %v145_v26 = vld [vmem:[#allocation4 + $0xc0] sm:$0xff]  ;;  %v144_v29 = vld [vmem:[#allocation4 + $0xb8] sm:$0xff] }
  0x15   :  { %156 = vmatpush.msra.mxu2 %v149_v14  ;;  %v63_v28 = vld [vmem:[#allocation2 + $0x20] sm:$0xff]  ;;  %v105_v30 = vld [vmem:[#allocation4 + $0x30] sm:$0xff]  ;;  %v62_v31 = vld [vmem:[#allocation2 + $0x18] sm:$0xff] }
  0x16   :  { %84 = vmatpush.msra.mxu0 %v69_v10  ;;  %119 = vmatpush.msra.mxu1 %v110_v15  ;;  %v143_v32 = vld [vmem:[#allocation4 + $0xb0] sm:$0xff]  ;;  %v104_v33 = vld [vmem:[#allocation4 + $0x28] sm:$0xff]  ;;  %v103_v36 = vld [vmem:[#allocation4 + $0x20] sm:$0xff] }
  0x17   :  { %157 = vmatpush.msra.mxu2 %v148_v17  ;;  %v61_v34 = vld [vmem:[#allocation2 + $0x10] sm:$0xff]  ;;  %v142_v35 = vld [vmem:[#allocation4 + $0xa8] sm:$0xff]  ;;  %v141_v38 = vld [vmem:[#allocation4 + $0xa0] sm:$0xff] }
  0x18   :  { %85 = vmatpush.msra.mxu0 %v68_v13  ;;  %120 = vmatpush.msra.mxu1 %v109_v18  ;;  %v60_v37 = vld [vmem:[#allocation2 + $0x8] sm:$0xff]  ;;  %v102_v39 = vld [vmem:[#allocation4 + $0x18] sm:$0xff]  ;;  %v59_v40 = vld [vmem:[#allocation2] sm:$0xff] }
  0x19   :  { %158 = vmatpush.msra.mxu2 %v147_v20  ;;  %v140_v41 = vld [vmem:[#allocation4 + $0x98] sm:$0xff]  ;;  %v58_v42 = vld [vmem:[%s521_s0] sm:$0xff]  ;;  %v101_v43 = vld [vmem:[#allocation4 + $0x10] sm:$0xff] }
  0x1a   :  { %86 = vmatpush.msra.mxu0 %v67_v16  ;;  %121 = vmatpush.msra.mxu1 %v108_v21  ;;  %v139_v44 = vld [vmem:[#allocation4 + $0x90] sm:$0xff]  ;;  %v100_v45 = vld [vmem:[#allocation4 + $0x8] sm:$0xff]  ;;  %v99_v47 = vld [vmem:[#allocation4] sm:$0xff] }
  0x1b   :  { %159 = vmatpush.msra.mxu2 %v146_v23  ;;  %v138_v46 = vld [vmem:[#allocation4 + $0x88] sm:$0xff]  ;;  %v137_v48 = vld [vmem:[#allocation4 + $0x80] sm:$0xff]  ;;  %v238_v54 = vld [vmem:[#allocation4 + $0x178] sm:$0xff] }
  0x1c   :  { %87 = vmatpush.msra.mxu0 %v66_v19  ;;  %122 = vmatpush.msra.mxu1 %v107_v24  ;;  %v345_v49 = vld [vmem:[%s523_s2] ss:$0 sm:$0xff]  ;;  %v334_v52 = vld [vmem:[%s524_s3 + $0x8] sm:$0xff]  ;;  %v237_v56 = vld [vmem:[#allocation4 + $0x170] sm:$0xff] }
  0x1d   :  { %160 = vmatpush.msra.mxu2 %v145_v26  ;;  %v236_v57 = vld [vmem:[#allocation4 + $0x168] sm:$0xff]  ;;  %v235_v58 = vld [vmem:[#allocation4 + $0x160] sm:$0xff]  ;;  %v234_v60 = vld [vmem:[#allocation4 + $0x158] sm:$0xff] }
  0x1e   :  { %88 = vmatpush.msra.mxu0 %v65_v22  ;;  %123 = vmatpush.msra.mxu1 %v106_v27  ;;  %v135_v59 = vld [vmem:[%s524_s3] sm:$0xff]  ;;  %v233_v61 = vld [vmem:[#allocation4 + $0x150] sm:$0xff]  ;;  %v232_v62 = vld [vmem:[#allocation4 + $0x148] sm:$0xff] }
  0x1f   :  { %161 = vmatpush.msra.mxu2 %v144_v29  ;;  %v231_v63 = vld [vmem:[#allocation4 + $0x140] sm:$0xff]  ;;  %v230_v0 = vld [vmem:[#allocation4 + $0x138] sm:$0xff]  ;;  %v229_v1 = vld [vmem:[#allocation4 + $0x130] sm:$0xff] }
  0x20   :  { %89 = vmatpush.msra.mxu0 %v64_v25  ;;  %124 = vmatpush.msra.mxu1 %v105_v30  ;;  %v228_v2 = vld [vmem:[#allocation4 + $0x128] sm:$0xff]  ;;  %v227_v3 = vld [vmem:[#allocation4 + $0x120] sm:$0xff]  ;;  %v226_v4 = vld [vmem:[#allocation4 + $0x118] sm:$0xff]  ;;  %v402_v30 = vmov 0  }
  0x21   :  { %162 = vmatpush.msra.mxu2 %v143_v32  ;;  %v225_v5 = vld [vmem:[#allocation4 + $0x110] sm:$0xff]  ;;  %v224_v6 = vld [vmem:[#allocation4 + $0x108] sm:$0xff]  ;;  %v223_v7 = vld [vmem:[#allocation4 + $0x100] sm:$0xff]  ;;  %344 = vset.pattern.permute.xlu0 %v402_v30 }
  0x22   :  { %90 = vmatpush.msra.mxu0 %v63_v28  ;;  %125 = vmatpush.msra.mxu1 %v104_v33  ;;  %v300_v9 = vld [vmem:[%s526_s5 + $0x78] sm:$0xff]  ;;  %v299_v10 = vld [vmem:[%s526_s5 + $0x70] sm:$0xff]  ;;  %v298_v11 = vld [vmem:[%s526_s5 + $0x68] sm:$0xff] }
  0x23   :  { %163 = vmatpush.msra.mxu2 %v142_v35  ;;  %v297_v12 = vld [vmem:[%s526_s5 + $0x60] sm:$0xff]  ;;  %v296_v14 = vld [vmem:[%s526_s5 + $0x58] sm:$0xff]  ;;  %v295_v16 = vld [vmem:[%s526_s5 + $0x50] sm:$0xff] }
  0x24   :  { %91 = vmatpush.msra.mxu0 %v62_v31  ;;  %126 = vmatpush.msra.mxu1 %v103_v36  ;;  %v294_v17 = vld [vmem:[%s526_s5 + $0x48] sm:$0xff]  ;;  %v293_v18 = vld [vmem:[%s526_s5 + $0x40] sm:$0xff]  ;;  %v292_v19 = vld [vmem:[%s526_s5 + $0x38] sm:$0xff] }
  0x25   :  { %164 = vmatpush.msra.mxu2 %v141_v38  ;;  %v291_v20 = vld [vmem:[%s526_s5 + $0x30] sm:$0xff]  ;;  %v290_v21 = vld [vmem:[%s526_s5 + $0x28] sm:$0xff]  ;;  %v289_v22 = vld [vmem:[%s526_s5 + $0x20] sm:$0xff] }
  0x26   :  { %92 = vmatpush.msra.mxu0 %v61_v34  ;;  %127 = vmatpush.msra.mxu1 %v102_v39  ;;  %v288_v23 = vld [vmem:[%s526_s5 + $0x18] sm:$0xff]  ;;  %v287_v24 = vld [vmem:[%s526_s5 + $0x10] sm:$0xff]  ;;  %v286_v27 = vld [vmem:[%s526_s5 + $0x8] sm:$0xff] }
  0x27   :  { %165 = vmatpush.msra.mxu2 %v140_v41  ;;  %v337_v25 = vld [vmem:[%s524_s3 + $0x10] sm:$0xff]  ;;  %v285_v28 = vld [vmem:[%s526_s5] sm:$0xff] }
  0x28   :  { %93 = vmatpush.msra.mxu0 %v60_v37  ;;  %128 = vmatpush.msra.mxu1 %v101_v43  ;;  %v301_v29 = vld [vmem:[%s527_s6] sm:$0xff] }
  0x29   :  { %166 = vmatpush.msra.mxu2 %v139_v44  ;;  %304 = vperm.xlu0 %344, %v301_v29  }
  0x2a   :  { %94 = vmatpush.msra.mxu0 %v59_v40  ;;  %129 = vmatpush.msra.mxu1 %v100_v45 }
  0x2b   :  { %95 = vmatmul.f32.vlgmr.msra.gmra.mxu0 %v58_v42  ;;  %167 = vmatpush.msra.mxu2 %v138_v46 }
  0x2c   :  { %130 = vmatpush.msra.mxu1 %v99_v47 }
  0x2d   :  { %168 = vmatpush.msra.mxu2 %v137_v48 }
  0x2e   :  { %307 = vmatpush.msrb.mxu1 %v300_v9 }
  0x30   :  { %308 = vmatpush.msrb.mxu1 %v299_v10 }
  0x32   :  { %309 = vmatpush.msrb.mxu1 %v298_v11 }
  0x34   :  { %310 = vmatpush.msrb.mxu1 %v297_v12 }
  0x36   :  { %311 = vmatpush.msrb.mxu1 %v296_v14 }
  0x38   :  { %312 = vmatpush.msrb.mxu1 %v295_v16 }
  0x3a   :  { %313 = vmatpush.msrb.mxu1 %v294_v17 }
  0x3c   :  { %314 = vmatpush.msrb.mxu1 %v293_v18 }
  0x3e   :  { %315 = vmatpush.msrb.mxu1 %v292_v19 }
  0x40   :  { %316 = vmatpush.msrb.mxu1 %v291_v20 }
  0x42   :  { %317 = vmatpush.msrb.mxu1 %v290_v21 }
  0x44   :  { %318 = vmatpush.msrb.mxu1 %v289_v22 }
  0x46   :  { %319 = vmatpush.msrb.mxu1 %v288_v23 }
  0x48   :  { %320 = vmatpush.msrb.mxu1 %v287_v24 }
  0x4a   :  { %321 = vmatpush.msrb.mxu1 %v286_v27 }
  0x4c   :  { %322 = vmatpush.msrb.mxu1 %v285_v28 }
  0x9b   :  { %v305_v33 = vpop.permute.xlu0 %304 }
  0xa8   :  { %v96_v50 = vpop.f32.mrf.mxu0 }
  0xa9   :  { %v97_v51 = vadd.f32 %v345_v49, %v96_v50 }
  0xab   :  { %131 = vmatmul.f32.vlgmr.msra.gmra.mxu1 %v97_v51  ;;  %169 = vmatmul.f32.vlgmr.msra.gmra.mxu2 %v97_v51 }
 0x128   :  { %v132_v55 = vpop.f32.mrf.mxu1 }
 0x12e   :  { %v170_v53 = vpop.f32.mrf.mxu2 }
 0x12f   :  { %194 = vmatpush.msra.mxu3 %v170_v53 }
 0x130   :  { %335 = vmatmul.msk.f32.vlgmr.msra.gmra.mxu3 %vm175_vm0, %v334_v52 }
 0x131   :  { %217 = vmatpush.msrb.mxu3 %v132_v55 }
 0x133   :  { %239 = vmatpush.msra.mxu3 %v238_v54 }
 0x135   :  { %240 = vmatpush.msra.mxu3 %v237_v56 }
 0x137   :  { %241 = vmatpush.msra.mxu3 %v236_v57 }
 0x138   :  { %336 = vmatmul.msk.f32.vlgmr.msrb.gmra.mxu3 %vm175_vm0, %v135_v59 }
 0x139   :  { %242 = vmatpush.msra.mxu3 %v235_v58 }
 0x13b   :  { %243 = vmatpush.msra.mxu3 %v234_v60 }
 0x13d   :  { %244 = vmatpush.msra.mxu3 %v233_v61 }
 0x13f   :  { %245 = vmatpush.msra.mxu3 %v232_v62 }
 0x141   :  { %246 = vmatpush.msra.mxu3 %v231_v63 }
 0x143   :  { %247 = vmatpush.msra.mxu3 %v230_v0 }
 0x145   :  { %248 = vmatpush.msra.mxu3 %v229_v1 }
 0x147   :  { %249 = vmatpush.msra.mxu3 %v228_v2 }
 0x149   :  { %250 = vmatpush.msra.mxu3 %v227_v3 }
 0x14b   :  { %251 = vmatpush.msra.mxu3 %v226_v4 }
 0x14d   :  { %252 = vmatpush.msra.mxu3 %v225_v5 }
 0x14f   :  { %253 = vmatpush.msra.mxu3 %v224_v6 }
 0x151   :  { %254 = vmatpush.msra.mxu3 %v223_v7 }
 0x152   :  { %255 = vmatmul.f32.vlgmr.msra.gmra.mxu3 %v97_v51 }
 0x1b3   :  { %v196_v8 = vpop.f32.mrf.mxu3 }
 0x1bb   :  { %v219_v13 = vpop.f32.mrf.mxu3 }
 0x1bc   :  { %v220_v15 = vadd.f32 %v219_v13, %v196_v8 }
 0x1d5   :  { %v256_v26 = vpop.f32.mrf.mxu3 }
 0x1d6   :  { %279 = vmatpush.msrb.mxu0 %v256_v26 }
 0x1d7   :  { %338 = vmatmul.msk.f32.vlgmr.msrb.gmra.mxu0 %vm175_vm0, %v337_v25 }
 0x254   :  { %v281_v31 = vpop.f32.mrf.mxu0 }
 0x255   :  { %v284_v32 = vadd.f32 %v281_v31, %v220_v15 }
 0x257   :  { %323 = vmatmul.f32.vlgmr.msrb.gmra.mxu1 %v284_v32 }
 0x2d4   :  { %v324_v34 = vpop.f32.mrf.mxu1 }
 0x2d5   :  { %v325_v35 = vadd.f32 %v324_v34, %v305_v33 }
 0x2d7   :  { %327 = vst [vmem:[%s528_s7] sm:$0xff] %v325_v35 }
 0x2d8   :  { %332 = vsyncpa [#allocation3], 1 }
 0x2d9   :  { %333 = vsyncpa [#allocation5], 1 }

</bundles_post_ra>
